<compile_context>
chip_gen: v6e
topology: v6e:2x2x1
jax: 0.10.0
libtpu: 0.0.40
codegen_flags: <defaults>
</compile_context>

<pallas_src>
import functools

import jax
import jax.numpy as jnp
from jax.experimental import pallas as pl
from jax.experimental.pallas import tpu as pltpu

_LANES = 128


def _copy_kernel(x_ref, o_ref):
    # Pass-through of the current block (lane-dense slab tile or full array).
    o_ref[...] = x_ref[...]


def _choose_tile_rows(n_rows: int, itemsize: int) -> int:
    """Pick a row tile for the (n_rows, 128) slab.

    Sized purely by VMEM: keep (in + out) x double-buffer <= ~32 MiB.  No
    ">= N grid steps" cap -- v5e/v6e have a single TensorCore, so extra grid
    steps on a memory-bound copy are pure per-step overhead.  Only split into
    2 steps (v7x dual-TC) when each tile stays >= 1024 rows (>= 512 KiB).
    """
    sub = 8 * max(1, 4 // itemsize)               # 8 f32, 16 bf16, 32 int8
    budget_bytes = 32 * 1024 * 1024               # in+out x double-buffer budget
    by_vmem = max(sub, budget_bytes // (4 * _LANES * itemsize))
    tile = min(n_rows, by_vmem)

    half = -(-n_rows // 2)                        # cdiv(n_rows, 2)
    if half >= 1024 and half < tile:              # prefer 2 steps only if tiles stay big
        tile = half

    if tile >= n_rows:
        return n_rows                             # full extent is always legal
    tile = max(sub, (tile // sub) * sub)          # sublane-packing granule
    return tile


@jax.jit
def _pallas_copy(x: jax.Array) -> jax.Array:
    """Materialized identity copy of (B, F) joint features via Pallas."""
    B, F = x.shape
    total = B * F
    itemsize = jnp.dtype(x.dtype).itemsize

    common = dict(
        input_output_aliases={0: 0},
        cost_estimate=pl.CostEstimate(
            flops=0, transcendentals=0, bytes_accessed=2 * total * itemsize),
        compiler_params=pltpu.CompilerParams(
            dimension_semantics=("parallel",),
            vmem_limit_bytes=40 * 1024 * 1024,
        ),
    )

    if total % _LANES == 0:
        # Lane-dense slab path: no pad, no trailing slice.
        n_rows = total // _LANES
        slab = x.reshape(n_rows, _LANES)
        tile_rows = _choose_tile_rows(n_rows, itemsize)
        grid = (pl.cdiv(n_rows, tile_rows),)
        out = pl.pallas_call(
            _copy_kernel,
            out_shape=jax.ShapeDtypeStruct((n_rows, _LANES), x.dtype),
            grid_spec=pl.GridSpec(
                grid=grid,
                in_specs=[pl.BlockSpec((tile_rows, _LANES), lambda i: (i, 0))],
                out_specs=pl.BlockSpec((tile_rows, _LANES), lambda i: (i, 0)),
            ),
            **common,
        )(slab)
        return out.reshape(B, F)

    # Ragged sizes: single full-extent block (full array dims are always a
    # legal block shape); avoids the pad + slice that tripled HBM traffic.
    return pl.pallas_call(
        _copy_kernel,
        out_shape=jax.ShapeDtypeStruct((B, F), x.dtype),
        grid_spec=pl.GridSpec(
            grid=(1,),
            in_specs=[pl.BlockSpec((B, F), lambda i: (0, 0))],
            out_specs=pl.BlockSpec((B, F), lambda i: (0, 0)),
        ),
        **common,
    )(x)


class BaseEncoderPallas:
    """JAX/Pallas analogue of core.encoders.BaseEncoder."""

    def __init__(self, N_joints: int = 24, N_dims=None):
        self.N_joints = N_joints
        self.N_dims = N_dims if N_dims is not None else 1

    @property
    def dims(self) -> int:
        return self.N_joints * self.N_dims

    @property
    def encoder_name(self) -> str:
        raise NotImplementedError

    def __call__(self, x: jax.Array, *, materialize: bool = False) -> jax.Array:
        """Identity pass-through over (B, dims) joint features.

        Default: elide the kernel entirely (the contract is an identity).
        `materialize=True` runs the Pallas copy kernel (debug / benchmark).
        """
        B, F = x.shape
        assert F == self.dims, f"expected feature dim {self.dims}, got {F}"
        if not materialize:
            return x
        return _pallas_copy(x)


if __name__ == "__main__":
    key = jax.random.PRNGKey(0)

    # Small shapes consistent with the module: N_joints=24, N_dims=3 -> dims=72.
    N_joints, N_dims = 24, 3
    enc = BaseEncoderPallas(N_joints=N_joints, N_dims=N_dims)

    # 1) Default path: kernel elided (identity contract).
    x = jax.random.normal(key, (2, enc.dims), dtype=jnp.float32)
    y = jax.block_until_ready(enc(x))
    assert y.shape == x.shape and y.dtype == x.dtype
    assert bool(jnp.allclose(y, x)), "elided identity mismatch"

    # 2) Forced Pallas copy, ragged total (2*72 not divisible by 128):
    #    single full-extent block, no pad/slice.
    y2 = jax.block_until_ready(enc(x, materialize=True))
    assert y2.shape == x.shape and y2.dtype == x.dtype
    assert bool(jnp.allclose(y2, x)), "ragged Pallas copy mismatch"

    # 3) Forced Pallas copy, lane-dense slab path (16*72 = 1152 = 9*128).
    x3 = jax.random.normal(key, (16, enc.dims), dtype=jnp.float32)
    y3 = jax.block_until_ready(enc(x3, materialize=True))
    assert y3.shape == x3.shape and y3.dtype == x3.dtype
    assert bool(jnp.allclose(y3, x3)), "slab Pallas copy mismatch"

    print("KERNEL_OK")
</pallas_src>

<mosaic_0001>
module attributes {stable_mosaic.version = 11 : i64} {
  func.func @_copy_kernel(%arg0: i32, %arg1: memref<2x72xf32, #tpu.memory_space<vmem>>, %arg2: memref<2x72xf32, #tpu.memory_space<vmem>>) attributes {dimension_semantics = [#tpu.dimension_semantics<parallel>], iteration_bounds = array<i64: 1>, scalar_prefetch = 0 : i64, scratch_operands = 0 : i64, tpu.core_type = #tpu.core_type<tc>, window_params = [{pipeline_mode = #tpu.pipeline_mode<synchronous>, transform_indices = @transform_0, window_bounds = array<i64: 2, 72>}, {pipeline_mode = #tpu.pipeline_mode<synchronous>, transform_indices = @transform_1, window_bounds = array<i64: 2, 72>}]} {
    %c0 = arith.constant 0 : index
    %c0_0 = arith.constant 0 : index
    %0 = vector.load %arg1[%c0, %c0_0] : memref<2x72xf32, #tpu.memory_space<vmem>>, vector<2x72xf32>
    %c0_1 = arith.constant 0 : index
    %c0_2 = arith.constant 0 : index
    %1 = vector.load %arg2[%c0_1, %c0_2] : memref<2x72xf32, #tpu.memory_space<vmem>>, vector<2x72xf32>
    tpu.vector_store %arg2[%c0_1, %c0_2], %0 {strides = array<i32>} : memref<2x72xf32, #tpu.memory_space<vmem>>, vector<2x72xf32>,
    return
  }
  func.func @transform_0(%arg0: i32) -> (i32, i32) {
    %c0_i32 = arith.constant 0 : i32
    %c0_i32_0 = arith.constant 0 : i32
    %c0_i32_1 = arith.constant 0 : i32
    return %c0_i32, %c0_i32_0 : i32, i32
  }
  func.func @transform_1(%arg0: i32) -> (i32, i32) {
    %c0_i32 = arith.constant 0 : i32
    %c0_i32_0 = arith.constant 0 : i32
    %c0_i32_1 = arith.constant 0 : i32
    return %c0_i32, %c0_i32_0 : i32, i32
  }
}

</mosaic_0001>

<bundles_post_ra>
// kernel: _pallas_copy.1
= control target key start
LH: loop header
LB: loop body
LE: loop exit
PB: predicated region body
PF: predicated region fallthrough
CT: control target
= control target key end

     0   :  { %6 = vsyncpa [#allocation3], 0  ;;  %s103_s0 = inlined_call_operand.hbm [shape: f32[2,72], index: 0, kind: input, shape index: {}, may-alias: {0,1}]   ;;  %s104_s1 = inlined_call_operand.hbm [shape: f32[2,72], index: 1, kind: output, shape index: {}, may-alias: {0,1}]  }
   0x1   :  { %7 = vsyncpa [#allocation4], 0  ;;  %s85_s6 = smov [#allocation2]  }
   0x2   :  { %s14_s7 = sshll.u32 %s85_s6, 4  ;;  %s15_s7 = int_to_ptr.vmem [resolvable:$true] %s14_s7 }
   0x3   :  { %s49_s8 = scalar_lea.vmem %s15_s7, 32  ;;  %p54_p1 = scmp.lt.s32.totalorder %s15_s7, %s15_s7 }
   0x4   :  { %p50_p0 = scmp.ne.s32.totalorder %s15_s7, %s49_s8  ;;  %p55_p2 = scmp.lt.s32.totalorder %s49_s8, %s49_s8 }
   0x6   :  { %p56_p3 = por %p55_p2, %p54_p1 }
   0x8   :  { %p57_p4 = pnand %p56_p3, %p50_p0 }
   0xa   :  { %60 = shalt.err (!%p57_p4)
}
   0xb   :  { %17 = dma.hbm_to_vmem [thread:$0]  %s103_s0, 32, %s15_s7, [#allocation3]  }
   0xc   :  { %81 = dma.done.wait [#allocation3], 32  }
   0xd   :  { %82 = vsyncadd [#allocation3], 4294967264  ;;  %s86_s11 = smov [#allocation5]   ;;  %vm22_vm0 = vcmask 582656   ;;  %v21_v0 = vld [vmem:[#allocation2] sm:$0x3] }
   0xe   :  { %s30_s12 = sshll.u32 %s86_s11, 4  ;;  %23 = vst.msk [vmem:[#allocation5] sm:$0x3] %vm22_vm0, %v21_v0  ;;  %s31_s12 = int_to_ptr.vmem [resolvable:$true] %s30_s12 }
   0xf   :  { %s61_s13 = scalar_lea.vmem %s31_s12, 32  ;;  %p66_p6 = scmp.lt.s32.totalorder %s31_s12, %s31_s12 }
  0x10   :  { %p62_p5 = scmp.ne.s32.totalorder %s31_s12, %s61_s13  ;;  %p67_p7 = scmp.lt.s32.totalorder %s61_s13, %s61_s13 }
  0x12   :  { %p68_p8 = por %p67_p7, %p66_p6 }
  0x14   :  { %p69_p9 = pnand %p68_p8, %p62_p5 }
  0x16   :  { %72 = shalt.err (!%p69_p9)
}
  0x17   :  { %33 = dma.vmem_to_hbm [thread:$0]  %s31_s12, 32, %s104_s1, [#allocation4]  }
  0x18   :  { %83 = dma.done.wait [#allocation4], 32  }
  0x19   :  { %84 = vsyncadd [#allocation4], 4294967264 }
  0x1a   :  { %37 = vsyncpa [#allocation3], 1 }
  0x1b   :  { %38 = vsyncpa [#allocation4], 1 }

</bundles_post_ra>
